<compile_context>
chip_gen: v6e
topology: v6e:2x2x1
jax: 0.10.0
libtpu: 0.0.40
codegen_flags: <defaults>
</compile_context>

<pallas_src>
import functools

import jax
import jax.numpy as jnp
from jax.experimental import pallas as pl
from jax.experimental.pallas import tpu as pltpu


def _round_up(n, m):
    return ((n + m - 1) // m) * m


def _choose_tb(batch, row_bytes, tb_max):
    """Pick a batch-tile size: VMEM-bounded, >=2 grid steps when possible."""
    stream_budget = 32 << 20  # double-buffered x+out tiles; fits v7x's 64 MiB
    cap = max(8, ((stream_budget // (2 * row_bytes)) // 8) * 8)
    tb_max = max(8, min(tb_max, cap))
    if batch <= 16:
        return min(tb_max, _round_up(batch, 8))
    # Aim for at least 2 grid steps so both v7x TensorCores get work.
    half = _round_up(pl.cdiv(batch, 2), 16)
    tb = min(tb_max, half)
    if tb >= 512:
        tb = (tb // 256) * 256  # MXU-friendly rounding for large tiles
    return max(8, tb)


def _make_kernel(first_input):
    def kernel(x_ref, w1_ref, b1_ref, w2_ref, b2_ref,
               w3a_ref, w3b_ref, b3_ref, o_ref):
        # Cast the streamed f32 tile to bf16 on-chip (MXU-native inputs).
        x = x_ref[...].astype(jnp.bfloat16)
        x1 = x[:, :first_input]
        x2 = x[:, first_input:]
        # Branch matmuls, f32 accumulation + bias + ReLU.
        h1 = jnp.dot(x1, w1_ref[...], preferred_element_type=jnp.float32) + b1_ref[...]
        h2 = jnp.dot(x2, w2_ref[...], preferred_element_type=jnp.float32) + b2_ref[...]
        h1 = jnp.maximum(h1, 0.0).astype(jnp.bfloat16)
        h2 = jnp.maximum(h2, 0.0).astype(jnp.bfloat16)
        # Last layer split over the concat axis: [h1|h2] @ W3 == h1@W3a + h2@W3b.
        out = jnp.dot(h1, w3a_ref[...], preferred_element_type=jnp.float32)
        out = out + jnp.dot(h2, w3b_ref[...], preferred_element_type=jnp.float32)
        o_ref[...] = out + b3_ref[...]
    return kernel


def prepare_params(params):
    """One-time prep: bf16 weights, W3 split into the two h-halves,
    output dim zero-padded to a lane-dense multiple of 128."""
    w1, b1, w2, b2, w3, b3 = params
    hidden = w1.shape[1]
    out_size = w3.shape[1]
    out_pad = _round_up(out_size, 128)
    pad = out_pad - out_size
    w3p = jnp.pad(w3, ((0, 0), (0, pad)))   # exact zeros in padded columns
    b3p = jnp.pad(b3, (0, pad))
    return (
        w1.astype(jnp.bfloat16),
        b1.astype(jnp.float32).reshape(1, hidden),
        w2.astype(jnp.bfloat16),
        b2.astype(jnp.float32).reshape(1, hidden),
        w3p[:hidden].astype(jnp.bfloat16),
        w3p[hidden:].astype(jnp.bfloat16),
        b3p.astype(jnp.float32).reshape(1, out_pad),
    )


@functools.partial(jax.jit, static_argnames=("first_input", "out_size", "tb_max"))
def ann_forward(x, prepped, *, first_input, out_size, tb_max=1024):
    """x: [B, first_input + second_input] float32; prepped from prepare_params."""
    w1, b1, w2, b2, w3a, w3b, b3p = prepped
    B, F_total = x.shape
    hidden = w1.shape[1]
    out_pad = b3p.shape[1]

    row_bytes = (F_total + out_pad) * 4          # streamed f32 in + f32 out per row
    TB = _choose_tb(B, row_bytes, tb_max)
    grid = (pl.cdiv(B, TB),)                     # ragged last block is clipped

    # Explicit VMEM budget (above 16/32 MiB scoped defaults, <= v7x's 64 MiB).
    weights_bytes = ((w1.size + w2.size + w3a.size + w3b.size) * 2
                     + (b1.size + b2.size + b3p.size) * 4)
    stream_bytes = TB * row_bytes
    interm_bytes = TB * 2 * hidden * (4 + 2)     # h in f32 + bf16 copies
    vmem_limit = int(min(64 << 20,
                         max(33 << 20,
                             2 * (weights_bytes + stream_bytes)
                             + interm_bytes + (4 << 20))))

    const = lambda a: pl.BlockSpec(a.shape, lambda i: (0,) * a.ndim)
    # TODO(synk): pipeline_mode=pl.Buffered(1) on the constant specs would halve
    # resident weight VMEM; omitted since single-buffer pipeline_mode support is
    # version-dependent and weights are tiny relative to the budget here.

    out = pl.pallas_call(
        _make_kernel(first_input),
        out_shape=jax.ShapeDtypeStruct((B, out_pad), jnp.float32),
        grid=grid,
        in_specs=[
            pl.BlockSpec((TB, F_total), lambda i: (i, 0)),   # x tile streams (f32)
            const(w1), const(b1), const(w2), const(b2),      # weights VMEM-resident
            const(w3a), const(w3b), const(b3p),
        ],
        out_specs=pl.BlockSpec((TB, out_pad), lambda i: (i, 0)),  # lane-dense output
        compiler_params=pltpu.CompilerParams(
            dimension_semantics=("parallel",),
            vmem_limit_bytes=vmem_limit),
    )(x, w1, b1, w2, b2, w3a, w3b, b3p)

    return out[:, :out_size]


def init_params(key, first_input, second_input, hidden_size, output_size):
    """PyTorch-Linear-style init U(-1/sqrt(fan_in), 1/sqrt(fan_in)); weights [in, out]."""
    ks = jax.random.split(key, 6)

    def lin(kw, kb, fan_in, fan_out):
        bound = 1.0 / jnp.sqrt(fan_in)
        w = jax.random.uniform(kw, (fan_in, fan_out), jnp.float32, -bound, bound)
        b = jax.random.uniform(kb, (fan_out,), jnp.float32, -bound, bound)
        return w, b

    w1, b1 = lin(ks[0], ks[1], first_input, hidden_size)
    w2, b2 = lin(ks[2], ks[3], second_input, hidden_size)
    w3, b3 = lin(ks[4], ks[5], hidden_size * 2, output_size)
    return (w1, b1, w2, b2, w3, b3)


def ann_reference(x, params, first_input):
    w1, b1, w2, b2, w3, b3 = params
    x1, x2 = x[:, :first_input], x[:, first_input:]
    h1 = jnp.maximum(x1 @ w1 + b1, 0.0)
    h2 = jnp.maximum(x2 @ w2 + b2, 0.0)
    h = jnp.concatenate([h1, h2], axis=1)
    return h @ w3 + b3


if __name__ == "__main__":
    batch = 8
    first_input = 16
    second_input = 16
    hidden_size = 32
    output_size = 8

    key = jax.random.PRNGKey(0)
    kx, kp = jax.random.split(key)
    x = jax.random.normal(kx, (batch, first_input + second_input), jnp.float32)
    params = init_params(kp, first_input, second_input, hidden_size, output_size)
    prepped = prepare_params(params)   # one-time weight prep (hoisted out of the call path)

    out = ann_forward(x, prepped, first_input=first_input, out_size=output_size)
    out = jax.block_until_ready(out)

    ref = ann_reference(x, params, first_input)
    assert out.shape == (batch, output_size)
    # Tolerance accounts for bf16 MXU inputs (f32 accumulation).
    assert jnp.allclose(out, ref, atol=2e-2, rtol=2e-2), "mismatch vs reference"

    print("KERNEL_OK")
</pallas_src>

<mosaic_0001>
module attributes {stable_mosaic.version = 11 : i64} {
  func.func @kernel(%arg0: i32, %arg1: memref<8x32xf32, #tpu.memory_space<vmem>>, %arg2: memref<16x32xbf16, #tpu.memory_space<vmem>>, %arg3: memref<1x32xf32, #tpu.memory_space<vmem>>, %arg4: memref<16x32xbf16, #tpu.memory_space<vmem>>, %arg5: memref<1x32xf32, #tpu.memory_space<vmem>>, %arg6: memref<32x128xbf16, #tpu.memory_space<vmem>>, %arg7: memref<32x128xbf16, #tpu.memory_space<vmem>>, %arg8: memref<1x128xf32, #tpu.memory_space<vmem>>, %arg9: memref<8x128xf32, #tpu.memory_space<vmem>>) attributes {dimension_semantics = [#tpu.dimension_semantics<parallel>], iteration_bounds = array<i64: 1>, scalar_prefetch = 0 : i64, scratch_operands = 0 : i64, tpu.core_type = #tpu.core_type<tc>, window_params = [{transform_indices = @transform_0, window_bounds = array<i64: 8, 32>}, {pipeline_mode = #tpu.pipeline_mode<synchronous>, transform_indices = @transform_1, window_bounds = array<i64: 16, 32>}, {pipeline_mode = #tpu.pipeline_mode<synchronous>, transform_indices = @transform_2, window_bounds = array<i64: 1, 32>}, {pipeline_mode = #tpu.pipeline_mode<synchronous>, transform_indices = @transform_3, window_bounds = array<i64: 16, 32>}, {pipeline_mode = #tpu.pipeline_mode<synchronous>, transform_indices = @transform_4, window_bounds = array<i64: 1, 32>}, {pipeline_mode = #tpu.pipeline_mode<synchronous>, transform_indices = @transform_5, window_bounds = array<i64: 32, 128>}, {pipeline_mode = #tpu.pipeline_mode<synchronous>, transform_indices = @transform_6, window_bounds = array<i64: 32, 128>}, {pipeline_mode = #tpu.pipeline_mode<synchronous>, transform_indices = @transform_7, window_bounds = array<i64: 1, 128>}, {transform_indices = @transform_8, window_bounds = array<i64: 8, 128>}]} {
    %c0 = arith.constant 0 : index
    %c0_0 = arith.constant 0 : index
    %0 = vector.load %arg1[%c0, %c0_0] : memref<8x32xf32, #tpu.memory_space<vmem>>, vector<8x32xf32>
    %1 = arith.truncf %0 : vector<8x32xf32> to vector<8x32xbf16>
    %2 = vector.extract_strided_slice %1 {offsets = [0, 0], sizes = [8, 16], strides = [1, 1]} : vector<8x32xbf16> to vector<8x16xbf16>
    %3 = vector.extract_strided_slice %1 {offsets = [0, 16], sizes = [8, 16], strides = [1, 1]} : vector<8x32xbf16> to vector<8x16xbf16>
    %c0_1 = arith.constant 0 : index
    %c0_2 = arith.constant 0 : index
    %4 = vector.load %arg2[%c0_1, %c0_2] : memref<16x32xbf16, #tpu.memory_space<vmem>>, vector<16x32xbf16>
    %cst = arith.constant dense<0.000000e+00> : vector<8x32xf32>
    %5 = tpu.matmul %2, %4, %cst {dimension_numbers = #tpu.dot_dimension_numbers<[1], [0], [0], [1], [0, 0, 1, 1], [], []>} : vector<8x16xbf16>, vector<16x32xbf16>, vector<8x32xf32> -> vector<8x32xf32>
    %c0_3 = arith.constant 0 : index
    %c0_4 = arith.constant 0 : index
    %6 = vector.load %arg3[%c0_3, %c0_4] : memref<1x32xf32, #tpu.memory_space<vmem>>, vector<1x32xf32>
    %7 = vector.broadcast %6 : vector<1x32xf32> to vector<8x32xf32>
    %8 = arith.addf %5, %7 : vector<8x32xf32>
    %c0_5 = arith.constant 0 : index
    %c0_6 = arith.constant 0 : index
    %9 = vector.load %arg4[%c0_5, %c0_6] : memref<16x32xbf16, #tpu.memory_space<vmem>>, vector<16x32xbf16>
    %cst_7 = arith.constant dense<0.000000e+00> : vector<8x32xf32>
    %10 = tpu.matmul %3, %9, %cst_7 {dimension_numbers = #tpu.dot_dimension_numbers<[1], [0], [0], [1], [0, 0, 1, 1], [], []>} : vector<8x16xbf16>, vector<16x32xbf16>, vector<8x32xf32> -> vector<8x32xf32>
    %c0_8 = arith.constant 0 : index
    %c0_9 = arith.constant 0 : index
    %11 = vector.load %arg5[%c0_8, %c0_9] : memref<1x32xf32, #tpu.memory_space<vmem>>, vector<1x32xf32>
    %12 = vector.broadcast %11 : vector<1x32xf32> to vector<8x32xf32>
    %13 = arith.addf %10, %12 : vector<8x32xf32>
    %cst_10 = arith.constant 0.000000e+00 : f32
    %14 = vector.broadcast %cst_10 : f32 to vector<8x32xf32>
    %15 = arith.maximumf %8, %14 : vector<8x32xf32>
    %16 = arith.truncf %15 : vector<8x32xf32> to vector<8x32xbf16>
    %cst_11 = arith.constant 0.000000e+00 : f32
    %17 = vector.broadcast %cst_11 : f32 to vector<8x32xf32>
    %18 = arith.maximumf %13, %17 : vector<8x32xf32>
    %19 = arith.truncf %18 : vector<8x32xf32> to vector<8x32xbf16>
    %c0_12 = arith.constant 0 : index
    %c0_13 = arith.constant 0 : index
    %20 = vector.load %arg6[%c0_12, %c0_13] : memref<32x128xbf16, #tpu.memory_space<vmem>>, vector<32x128xbf16>
    %cst_14 = arith.constant dense<0.000000e+00> : vector<8x128xf32>
    %21 = tpu.matmul %16, %20, %cst_14 {dimension_numbers = #tpu.dot_dimension_numbers<[1], [0], [0], [1], [0, 0, 1, 1], [], []>} : vector<8x32xbf16>, vector<32x128xbf16>, vector<8x128xf32> -> vector<8x128xf32>
    %c0_15 = arith.constant 0 : index
    %c0_16 = arith.constant 0 : index
    %22 = vector.load %arg7[%c0_15, %c0_16] : memref<32x128xbf16, #tpu.memory_space<vmem>>, vector<32x128xbf16>
    %cst_17 = arith.constant dense<0.000000e+00> : vector<8x128xf32>
    %23 = tpu.matmul %19, %22, %cst_17 {dimension_numbers = #tpu.dot_dimension_numbers<[1], [0], [0], [1], [0, 0, 1, 1], [], []>} : vector<8x32xbf16>, vector<32x128xbf16>, vector<8x128xf32> -> vector<8x128xf32>
    %24 = arith.addf %21, %23 : vector<8x128xf32>
    %c0_18 = arith.constant 0 : index
    %c0_19 = arith.constant 0 : index
    %25 = vector.load %arg8[%c0_18, %c0_19] : memref<1x128xf32, #tpu.memory_space<vmem>>, vector<1x128xf32>
    %26 = vector.broadcast %25 : vector<1x128xf32> to vector<8x128xf32>
    %27 = arith.addf %24, %26 : vector<8x128xf32>
    %c0_20 = arith.constant 0 : index
    %c0_21 = arith.constant 0 : index
    %28 = vector.load %arg9[%c0_20, %c0_21] : memref<8x128xf32, #tpu.memory_space<vmem>>, vector<8x128xf32>
    tpu.vector_store %arg9[%c0_20, %c0_21], %27 {strides = array<i32>} : memref<8x128xf32, #tpu.memory_space<vmem>>, vector<8x128xf32>,
    return
  }
  func.func @transform_0(%arg0: i32) -> (i32, i32) {
    %c0_i32 = arith.constant 0 : i32
    %c0_i32_0 = arith.constant 0 : i32
    return %arg0, %c0_i32 : i32, i32
  }
  func.func @transform_1(%arg0: i32) -> (i32, i32) {
    %c0_i32 = arith.constant 0 : i32
    %c0_i32_0 = arith.constant 0 : i32
    %c0_i32_1 = arith.constant 0 : i32
    return %c0_i32, %c0_i32_0 : i32, i32
  }
  func.func @transform_2(%arg0: i32) -> (i32, i32) {
    %c0_i32 = arith.constant 0 : i32
    %c0_i32_0 = arith.constant 0 : i32
    %c0_i32_1 = arith.constant 0 : i32
    return %c0_i32, %c0_i32_0 : i32, i32
  }
  func.func @transform_3(%arg0: i32) -> (i32, i32) {
    %c0_i32 = arith.constant 0 : i32
    %c0_i32_0 = arith.constant 0 : i32
    %c0_i32_1 = arith.constant 0 : i32
    return %c0_i32, %c0_i32_0 : i32, i32
  }
  func.func @transform_4(%arg0: i32) -> (i32, i32) {
    %c0_i32 = arith.constant 0 : i32
    %c0_i32_0 = arith.constant 0 : i32
    %c0_i32_1 = arith.constant 0 : i32
    return %c0_i32, %c0_i32_0 : i32, i32
  }
  func.func @transform_5(%arg0: i32) -> (i32, i32) {
    %c0_i32 = arith.constant 0 : i32
    %c0_i32_0 = arith.constant 0 : i32
    %c0_i32_1 = arith.constant 0 : i32
    return %c0_i32, %c0_i32_0 : i32, i32
  }
  func.func @transform_6(%arg0: i32) -> (i32, i32) {
    %c0_i32 = arith.constant 0 : i32
    %c0_i32_0 = arith.constant 0 : i32
    %c0_i32_1 = arith.constant 0 : i32
    return %c0_i32, %c0_i32_0 : i32, i32
  }
  func.func @transform_7(%arg0: i32) -> (i32, i32) {
    %c0_i32 = arith.constant 0 : i32
    %c0_i32_0 = arith.constant 0 : i32
    %c0_i32_1 = arith.constant 0 : i32
    return %c0_i32, %c0_i32_0 : i32, i32
  }
  func.func @transform_8(%arg0: i32) -> (i32, i32) {
    %c0_i32 = arith.constant 0 : i32
    %c0_i32_0 = arith.constant 0 : i32
    return %arg0, %c0_i32 : i32, i32
  }
}

</mosaic_0001>

<bundles_post_ra>
// kernel: ann_forward.1
= control target key start
LH: loop header
LB: loop body
LE: loop exit
PB: predicated region body
PF: predicated region fallthrough
CT: control target
= control target key end

     0   :  { %13 = vsyncpa [#allocation3], 0  ;;  %s663_s0 = inlined_call_operand.hbm [shape: f32[8,32], index: 0, kind: input, shape index: {}]   ;;  %s664_s1 = inlined_call_operand.hbm [shape: bf16[16,32], index: 1, kind: input, shape index: {}]   ;;  %s665_s2 = inlined_call_operand.vmem [shape: f32[1,32], index: 2, kind: input, shape index: {}]   ;;  %s666_s3 = inlined_call_operand.hbm [shape: bf16[16,32], index: 3, kind: input, shape index: {}]   ;;  %s667_s4 = inlined_call_operand.vmem [shape: f32[1,32], index: 4, kind: input, shape index: {}]   ;;  %s668_s5 = inlined_call_operand.hbm [shape: bf16[32,128], index: 5, kind: input, shape index: {}]   ;;  %s669_s6 = inlined_call_operand.hbm [shape: bf16[32,128], index: 6, kind: input, shape index: {}]   ;;  %s670_s7 = inlined_call_operand.vmem [shape: f32[1,128], index: 7, kind: input, shape index: {}]   ;;  %s671_s8 = inlined_call_operand.hbm [shape: f32[8,128], index: 8, kind: output, shape index: {}]  }
   0x1   :  { %14 = vsyncpa [#allocation6], 0 }
   0x2   :  { %15 = vsyncpa [#allocation9], 0 }
   0x3   :  { %16 = vsyncpa [#allocation4], 0  ;;  %s564_s27 = smov [#allocation5]  }
   0x4   :  { %s32_s28 = sshll.u32 %s564_s27, 4  ;;  %s33_s28 = int_to_ptr.vmem [resolvable:$true] %s32_s28 }
   0x5   :  { %s444_s29 = scalar_lea.vmem %s33_s28, 128  ;;  %p449_p1 = scmp.lt.s32.totalorder %s33_s28, %s33_s28 }
   0x6   :  { %p445_p0 = scmp.ne.s32.totalorder %s33_s28, %s444_s29  ;;  %p450_p2 = scmp.lt.s32.totalorder %s444_s29, %s444_s29 }
   0x8   :  { %p451_p3 = por %p450_p2, %p449_p1 }
   0xa   :  { %p452_p4 = pnand %p451_p3, %p445_p0 }
   0xc   :  { %455 = shalt.err (!%p452_p4)
}
   0xd   :  { %s565_s30 = smov 64   ;;  %s566_s9 = smov 4  }
   0xe   :  { %38 = dma.hbm_to_vmem [thread:$0]  %s664_s1, 128, %s33_s28, [#allocation6], %s565_s30, %s565_s30, %s566_s9  }
   0xf   :  { %s567_s12 = smov [#allocation8]   ;;  %s568_s14 = smov [#allocation2]  }
  0x10   :  { %s60_s13 = sshll.u32 %s567_s12, 4  ;;  %s23_s15 = sshll.u32 %s568_s14, 4  ;;  %s61_s13 = int_to_ptr.vmem [resolvable:$true] %s60_s13  ;;  %s24_s15 = int_to_ptr.vmem [resolvable:$true] %s23_s15 }
  0x11   :  { %s464_s16 = scalar_lea.vmem %s61_s13, 256  ;;  %p469_p6 = scmp.lt.s32.totalorder %s61_s13, %s61_s13 }
  0x12   :  { %p465_p5 = scmp.ne.s32.totalorder %s61_s13, %s464_s16  ;;  %p470_p7 = scmp.lt.s32.totalorder %s464_s16, %s464_s16 }
  0x14   :  { %p471_p8 = por %p470_p7, %p469_p6 }
  0x16   :  { %p472_p9 = pnand %p471_p8, %p465_p5 }
  0x18   :  { %475 = shalt.err (!%p472_p9)
}
  0x19   :  { %66 = dma.hbm_to_vmem [thread:$0]  %s668_s5, 256, %s61_s13, [#allocation9], %s565_s30, %s565_s30, %s566_s9  }
  0x1a   :  { %s484_s1 = scalar_lea.vmem %s24_s15, 128  ;;  %p489_p11 = scmp.lt.s32.totalorder %s24_s15, %s24_s15 }
  0x1b   :  { %p485_p10 = scmp.ne.s32.totalorder %s24_s15, %s484_s1  ;;  %p490_p12 = scmp.lt.s32.totalorder %s484_s1, %s484_s1 }
  0x1d   :  { %p491_p13 = por %p490_p12, %p489_p11 }
  0x1f   :  { %p492_p0 = pnand %p491_p13, %p485_p10 }
  0x21   :  { %495 = shalt.err (!%p492_p0)
}
  0x22   :  { %26 = dma.hbm_to_vmem [thread:$0]  %s663_s0, 128, %s24_s15, [#allocation3]  }
  0x23   :  { %s569_s21 = smov [#allocation7]   ;;  %s570_s23 = smov [#allocation10]  }
  0x24   :  { %s46_s22 = sshll.u32 %s569_s21, 4  ;;  %s72_s24 = sshll.u32 %s570_s23, 4  ;;  %s47_s22 = int_to_ptr.vmem [resolvable:$true] %s46_s22  ;;  %s73_s24 = int_to_ptr.vmem [resolvable:$true] %s72_s24 }
  0x25   :  { %s504_s25 = scalar_lea.vmem %s47_s22, 128  ;;  %p509_p2 = scmp.lt.s32.totalorder %s47_s22, %s47_s22 }
  0x26   :  { %p505_p1 = scmp.ne.s32.totalorder %s47_s22, %s504_s25  ;;  %p510_p3 = scmp.lt.s32.totalorder %s504_s25, %s504_s25 }
  0x28   :  { %p511_p4 = por %p510_p3, %p509_p2 }
  0x2a   :  { %p512_p5 = pnand %p511_p4, %p505_p1 }
  0x2c   :  { %515 = shalt.err (!%p512_p5)
}
  0x2d   :  { %52 = dma.hbm_to_vmem [thread:$0]  %s666_s3, 128, %s47_s22, [#allocation6], %s565_s30, %s565_s30, %s566_s9  }
  0x2e   :  { %s524_s0 = scalar_lea.vmem %s73_s24, 256  ;;  %p529_p7 = scmp.lt.s32.totalorder %s73_s24, %s73_s24 }
  0x2f   :  { %p525_p6 = scmp.ne.s32.totalorder %s73_s24, %s524_s0  ;;  %p530_p8 = scmp.lt.s32.totalorder %s524_s0, %s524_s0 }
  0x31   :  { %p531_p9 = por %p530_p8, %p529_p7 }
  0x33   :  { %p532_p10 = pnand %p531_p9, %p525_p6 }
  0x35   :  { %535 = shalt.err (!%p532_p10)
}
  0x36   :  { %78 = dma.hbm_to_vmem [thread:$0]  %s669_s6, 256, %s73_s24, [#allocation9], %s565_s30, %s565_s30, %s566_s9  }
  0x37   :  { %556 = dma.done.wait [#allocation3], 128  }
  0x38   :  { %557 = vsyncadd [#allocation3], 4294967168 }
  0x39   :  { %558 = dma.done.wait [#allocation6], 256  }
  0x3a   :  { %559 = vsyncadd [#allocation6], 4294967040 }
  0x3b   :  { %560 = dma.done.wait [#allocation9], 512  }
  0x3c   :  { %561 = vsyncadd [#allocation9], 4294966784  ;;  %v571_v0 = vmov 0.0   ;;  %vm572_vm0 = vmmov 0   ;;  %v97_v1 = vld [vmem:[#allocation2] sm:$0xff]  ;;  %v430_v3 = vld [vmem:[#allocation5] sm:$0xff]  }
  0x3d   :  { %391 = vmatprep.subr.bf16.mxu0 %v571_v0  ;;  %393 = vmatprep.mubr.msk.bf16.mxu0 %vm572_vm0, %v571_v0  ;;  %v98_v2 = vpack.c.bf16 %v97_v1, %v97_v1  ;;  %vm114_vm1 = vcmask 130048   ;;  %v431_v4 = vld [vmem:[#allocation7] sm:$0xff]   ;;  %s573_s3 = smov 112   ;;  %v432_v6 = vld [vmem:[#allocation8 + $0x8] sm:$0xff]   ;;  %v433_v8 = vld [vmem:[#allocation8] sm:$0xff]   ;;  %vm243_vm2 = vcmask 261120  }
  0x3e   :  { %397 = vmatprep.subr.bf16.mxu1 %v571_v0  ;;  %399 = vmatprep.mubr.msk.bf16.mxu1 %vm572_vm0, %v571_v0  ;;  %v434_v5 = vld [vmem:[#allocation10 + $0x8] sm:$0xff]   ;;  %v435_v9 = vld [vmem:[#allocation10] sm:$0xff]   ;;  %v368_v10 = vld [vmem:[%s665_s2] ss:$0 sm:$0xff]  ;;  %s574_s11 = smov [#allocation11]  }
  0x3f   :  { %168 = vrot.lane.b32.xlu0 %v98_v2, %s573_s3  ;;  %392 = vmatpush3.bf16.msra.mxu0 %v430_v3  ;;  %v371_v18 = vld [vmem:[%s667_s4] ss:$0 sm:$0xff]  ;;  %s357_s12 = sshll.u32 %s574_s11, 4  ;;  %s358_s12 = int_to_ptr.vmem [resolvable:$true] %s357_s12 }
  0x40   :  { %398 = vmatpush3.bf16.msra.mxu1 %v431_v4  ;;  %403 = vmatprep.subr.bf16.mxu0 %v571_v0  ;;  %v380_v31 = vld [vmem:[%s670_s7] ss:$0 sm:$0xff]  ;;  %s536_s4 = scalar_lea.vmem %s358_s12, 128  ;;  %p541_p12 = scmp.lt.s32.totalorder %s358_s12, %s358_s12 }
  0x41   :  { %411 = vmatprep.subr.bf16.mxu1 %v571_v0  ;;  %p537_p11 = scmp.ne.s32.totalorder %s358_s12, %s536_s4  ;;  %p542_p13 = scmp.lt.s32.totalorder %s536_s4, %s536_s4 }
  0x42   :  { %394 = vmatmul.mubr.msk.bf16.vlgmr.msra.gmra.mxu0 %vm114_vm1, %v98_v2 }
  0x43   :  { %407 = vmatprep.mubr.msk.bf16.mxu0 %vm572_vm0, %v571_v0  ;;  %404 = vmatpush3.bf16.msra.mxu0 %v434_v5  ;;  %p543_p0 = por %p542_p13, %p541_p12 }
  0x44   :  { %405 = vmatprep.subr.bf16.mxu0 %v571_v0 }
  0x45   :  { %p544_p1 = pnand %p543_p0, %p537_p11 }
  0x47   :  { %406 = vmatpush3.bf16.msra.mxu0 %v435_v9 }
  0xb1   :  { %v169_v7 = vpop.permute.xlu0 %168 }
  0xb2   :  { %400 = vmatmul.mubr.msk.bf16.vlgmr.msra.gmra.mxu1 %vm114_vm1, %v169_v7 }
  0xb3   :  { %412 = vmatpush3.bf16.msra.mxu1 %v432_v6  ;;  %415 = vmatprep.mubr.msk.bf16.mxu1 %vm572_vm0, %v571_v0 }
  0xb4   :  { %413 = vmatprep.subr.bf16.mxu1 %v571_v0 }
  0xb7   :  { %414 = vmatpush3.bf16.msra.mxu1 %v433_v8 }
 0x102   :  { %v152_v11 = vpop.f32.mrf.mxu0 }
 0x103   :  { %v153_v12 = vadd.f32 %v368_v10, %v152_v11 }
 0x104   :  { %v395_v13 = vpop.f32.mrf.mxu0 }
 0x105   :  { %v219_v14 = vmax.f32 %v153_v12, 0.0 }
 0x106   :  { %v155_v15 = vpop.f32.mrf.mxu0 }
 0x107   :  { %v220_v16 = vpack.c.bf16 %v219_v14, %v219_v14 }
 0x108   :  { %v396_v17 = vpop.f32.mrf.mxu0 }
 0x109   :  { %416 = vmatmul.mubr.msk.bf16.vlgmr.msra.gmra.mxu1 %vm243_vm2, %v220_v16 }
 0x172   :  { %v213_v19 = vpop.f32.mrf.mxu1 }
 0x173   :  { %v214_v20 = vadd.f32 %v371_v18, %v213_v19 }
 0x174   :  { %v401_v21 = vpop.f32.mrf.mxu1 }
 0x175   :  { %v221_v22 = vmax.f32 %v214_v20, 0.0 }
 0x176   :  { %v216_v23 = vpop.f32.mrf.mxu1 }
 0x177   :  { %v222_v24 = vpack.c.bf16 %v221_v22, %v221_v22 }
 0x178   :  { %v402_v25 = vpop.f32.mrf.mxu1 }
 0x179   :  { %408 = vmatmul.mubr.msk.bf16.vlgmr.msra.gmra.mxu0 %vm243_vm2, %v222_v24 }
 0x1c9   :  { %v336_v26 = vpop.f32.mrf.mxu1 }
 0x1cb   :  { %v417_v27 = vpop.f32.mrf.mxu1 }
 0x1cd   :  { %v339_v28 = vpop.f32.mrf.mxu1 }
 0x1cf   :  { %v418_v29 = vpop.f32.mrf.mxu1 }
 0x239   :  { %v281_v30 = vpop.f32.mrf.mxu0 }
 0x23a   :  { %v337_v32 = vadd.f32 %v336_v26, %v281_v30 }
 0x23b   :  { %v409_v33 = vpop.f32.mrf.mxu0 }
 0x23c   :  { %v349_v34 = vadd.f32 %v380_v31, %v337_v32 }
 0x23d   :  { %v284_v35 = vpop.f32.mrf.mxu0 }
 0x23e   :  { %350 = vst [vmem:[#allocation11] sm:$0xff] %v349_v34 }
 0x23f   :  { %v410_v36 = vpop.f32.mrf.mxu0 }
 0x240   :  { %547 = shalt.err (!%p544_p1)
}
 0x241   :  { %360 = dma.vmem_to_hbm [thread:$0]  %s358_s12, 128, %s671_s8, [#allocation4]  }
 0x242   :  { %562 = dma.done.wait [#allocation4], 128  }
 0x243   :  { %563 = vsyncadd [#allocation4], 4294967168 }
 0x244   :  { %364 = vsyncpa [#allocation3], 1 }
 0x245   :  { %365 = vsyncpa [#allocation6], 1 }
 0x246   :  { %366 = vsyncpa [#allocation9], 1 }
 0x247   :  { %367 = vsyncpa [#allocation4], 1 }

</bundles_post_ra>
